<compile_context>
chip_gen: v7x
topology: tpu7x:2x2x1
jax: 0.10.0
libtpu: 0.0.40
codegen_flags: <defaults>
</compile_context>

<pallas_src>
import jax
import jax.numpy as jnp
from jax.experimental import pallas as pl
from jax.experimental.pallas import tpu as pltpu

EPS = 1e-5  # torch.nn.LayerNorm default


# ----------------------------- shared math --------------------------------- #
def _layernorm(x, gamma, beta):
    mu = jnp.mean(x, axis=-1, keepdims=True)
    var = jnp.mean((x - mu) ** 2, axis=-1, keepdims=True)
    return (x - mu) * jax.lax.rsqrt(var + EPS) * gamma + beta


# ------------------------------- kernel ------------------------------------ #
def _node_to_edge_kernel(node_ref, g_ref, bln_ref, wqk_ref, bqk_ref,
                         wop_ref, wod_ref, bo_ref, out_ref,
                         qbf_s, kbf_s, qd_s, kd_s):
    i = pl.program_id(1)
    TI = out_ref.shape[1]
    N = out_ref.shape[2]
    H = wod_ref.shape[0]

    # ---- per-batch invariants: computed once per batch, cached in VMEM ----
    @pl.when(i == 0)
    def _():
        x = node_ref[0].astype(jnp.float32)                       # (N, nd)
        mu = jnp.mean(x, axis=-1, keepdims=True)
        var = jnp.mean((x - mu) ** 2, axis=-1, keepdims=True)
        xn = (x - mu) * jax.lax.rsqrt(var + EPS) * g_ref[...] + bln_ref[...]
        # single lane-dense (nd, 2H) projection; bf16 MXU inputs, f32 acc.
        s = jnp.dot(xn.astype(jnp.bfloat16), wqk_ref[...],
                    preferred_element_type=jnp.float32) + bqk_ref[...]
        q_bf = s[:, :H].astype(jnp.bfloat16)                      # (N, H)
        k_bf = s[:, H:].astype(jnp.bfloat16)                      # (N, H)
        qbf_s[...] = q_bf
        kbf_s[...] = k_bf
        # o_proj "diff" half; output bias folded into the q term.
        qd_s[...] = jnp.dot(q_bf, wod_ref[...],
                            preferred_element_type=jnp.float32) + bo_ref[...]
        kd_s[...] = jnp.dot(k_bf, wod_ref[...],
                            preferred_element_type=jnp.float32)

    # ---- per-i-tile work ----------------------------------------------------
    row = pl.multiple_of(i * TI, TI)
    q_bf = qbf_s[...]                          # (N, H)  bf16 (all j rows)
    k_bf = kbf_s[pl.ds(row, TI), :]            # (TI, H) bf16 (this i-row tile)
    kd = kd_s[pl.ds(row, TI), :]               # (TI, E) f32

    # prod[i, j, h] = k[i, h] * q[j, h]; computed directly in bf16.
    prod = (k_bf[:, None, :] * q_bf[None, :, :]).reshape(TI * N, H)
    out = jnp.dot(prod, wop_ref[...], preferred_element_type=jnp.float32)  # (TI*N, E)
    E = out.shape[-1]
    res = out.reshape(TI, N, E) + qd_s[...][None, :, :] - kd[:, None, :]
    out_ref[0] = res.astype(out_ref.dtype)


# --------------------------- sizing helpers --------------------------------- #
def _vmem_capacity_bytes():
    try:
        return int(pltpu.get_tpu_info().vmem_capacity_bytes)
    except Exception:
        return 64 * 1024 * 1024  # conservative: v7x per-TC physical VMEM


def _estimate_vmem_bytes(TI, N, nd, H, E, out_bytes):
    out_tile = TI * N * E * out_bytes           # output block
    temps = 2 * TI * N * E * 4                  # 'out' + 'res' f32 values
    prod = TI * N * H * 2                       # bf16 outer product
    scratch = 2 * N * H * 2 + 2 * N * E * 4     # q/k bf16 + qd/kd f32 caches
    inputs = 2 * N * nd * 4                     # node block (double-buffered)
    weights = nd * 2 * H * 2 + 2 * H * E * 2 + (2 * H + E + 2 * nd + N) * 4
    return 2 * out_tile + temps + prod + scratch + inputs + weights


def _pick_row_tile(N, nd, H, E, out_bytes, vmem_budget):
    # Divisors of N that keep a clean tiling (multiples of 8, or N itself).
    cands = sorted({d for d in range(1, N + 1)
                    if N % d == 0 and (d % 8 == 0 or d == N)}, reverse=True)
    for d in cands:  # descending: biggest tile that fits and isn't wasteful
        out_tile = d * N * E * out_bytes
        fits = _estimate_vmem_bytes(d, N, nd, H, E, out_bytes) <= vmem_budget
        if fits and (out_tile <= 8 * 1024 * 1024 or d == cands[-1]):
            return d
    return cands[-1]


# ------------------------------- wrapper ------------------------------------ #
def node_to_edge(node, params, *, row_tile=None, out_dtype=jnp.bfloat16):
    B, N, node_dim = node.shape
    Wp, bp = params["proj_w"], params["proj_b"]        # (nd, 2H), (2H,)
    Wo, bo = params["o_proj_w"], params["o_proj_b"]    # (2H, E),  (E,)
    H = Wp.shape[1] // 2
    E = Wo.shape[1]
    assert Wo.shape[0] == 2 * H
    out_bytes = jnp.dtype(out_dtype).itemsize

    cap = _vmem_capacity_bytes()
    if row_tile is None:
        row_tile = _pick_row_tile(N, node_dim, H, E, out_bytes, int(cap * 0.6))
    assert N % row_tile == 0, "N must be divisible by the i-row tile"
    TI = row_tile

    est = _estimate_vmem_bytes(TI, N, node_dim, H, E, out_bytes)
    vmem_limit = int(min(cap * 0.85, max(2 * est + (8 << 20), 32 << 20)))

    # Pre-cast matmul weights to bf16 (halves weight DMA); biases / LN params
    # stay f32 and are reshaped to (1, dim) to avoid sublane padding.
    wqk = Wp.astype(jnp.bfloat16)                       # (nd, 2H) lane-dense
    bqk = bp.reshape(1, -1).astype(jnp.float32)         # (1, 2H)
    wop = Wo[:H].astype(jnp.bfloat16)                   # (H, E)  "prod" half
    wod = Wo[H:].astype(jnp.bfloat16)                   # (H, E)  "diff" half
    bo2 = bo.reshape(1, -1).astype(jnp.float32)         # (1, E)
    g2 = params["ln_g"].reshape(1, -1).astype(jnp.float32)
    bln2 = params["ln_b"].reshape(1, -1).astype(jnp.float32)

    grid = (B, N // TI)
    flops = B * (2 * N * node_dim * 2 * H          # projection
                 + 2 * (2 * N) * H * E             # qd / kd
                 + N * N * H                       # outer product (VPU)
                 + 2 * N * N * H * E               # prod @ W_o[:H]
                 + 2 * N * N * E)                  # epilogue adds
    weight_bytes = (wqk.nbytes + wop.nbytes + wod.nbytes + bqk.nbytes
                    + bo2.nbytes + g2.nbytes + bln2.nbytes)
    bytes_accessed = node.nbytes + weight_bytes + B * N * N * E * out_bytes
    cost = pl.CostEstimate(flops=int(flops), transcendentals=int(B * N),
                           bytes_accessed=int(bytes_accessed))

    args = (g2, bln2, wqk, bqk, wop, wod, bo2)
    vmem_spec = pl.BlockSpec(memory_space=pltpu.MemorySpace.VMEM)

    return pl.pallas_call(
        _node_to_edge_kernel,
        out_shape=jax.ShapeDtypeStruct((B, N, N, E), out_dtype),
        grid=grid,
        in_specs=[pl.BlockSpec((1, N, node_dim), lambda b, i: (b, 0, 0))]
                 + [vmem_spec] * len(args),
        out_specs=pl.BlockSpec((1, TI, N, E), lambda b, i: (b, i, 0, 0)),
        scratch_shapes=[
            pltpu.VMEM((N, H), jnp.bfloat16),   # q (all rows), bf16
            pltpu.VMEM((N, H), jnp.bfloat16),   # k (all rows), bf16
            pltpu.VMEM((N, E), jnp.float32),    # qd = q @ W_o[H:] + b_o
            pltpu.VMEM((N, E), jnp.float32),    # kd = k @ W_o[H:]
        ],
        compiler_params=pltpu.CompilerParams(
            dimension_semantics=("parallel", "arbitrary"),
            vmem_limit_bytes=vmem_limit),
        cost_estimate=cost,
    )(node, *args)


# --------------------------- parameter construction ------------------------- #
def init_node_to_edge_params(key, node_dim, edge_dim, hidden_dim=None):
    hidden_dim = node_dim if hidden_dim is None else hidden_dim
    k1, k2 = jax.random.split(key, 2)
    s1 = 1.0 / float(node_dim) ** 0.5
    s2 = 1.0 / float(2 * hidden_dim) ** 0.5
    return {
        "ln_g": jnp.ones((node_dim,), jnp.float32),
        "ln_b": jnp.zeros((node_dim,), jnp.float32),
        # Linear weights stored (in_features, out_features): x @ W + b.
        "proj_w": jax.random.uniform(k1, (node_dim, 2 * hidden_dim), jnp.float32, -s1, s1),
        "proj_b": jnp.zeros((2 * hidden_dim,), jnp.float32),      # torch.nn.init.zeros_
        "o_proj_w": jax.random.uniform(k2, (2 * hidden_dim, edge_dim), jnp.float32, -s2, s2),
        "o_proj_b": jnp.zeros((edge_dim,), jnp.float32),          # torch.nn.init.zeros_
    }


# ------------------------------ references ---------------------------------- #
def ref_node_to_edge_f32(node, p):
    """Straight f32 port of the PyTorch forward (semantics reference)."""
    s = _layernorm(node, p["ln_g"], p["ln_b"])
    s = s @ p["proj_w"] + p["proj_b"]
    H = p["proj_w"].shape[1] // 2
    q, k = s[..., :H], s[..., H:]
    prod = q[:, None, :, :] * k[:, :, None, :]
    diff = q[:, None, :, :] - k[:, :, None, :]
    x = jnp.concatenate([prod, diff], axis=-1)
    return x @ p["o_proj_w"] + p["o_proj_b"]


def ref_node_to_edge_mirrored(node, p, out_dtype=jnp.bfloat16):
    """Reference mirroring the kernel's exact bf16/f32 numerics."""
    H = p["proj_w"].shape[1] // 2
    xn = _layernorm(node.astype(jnp.float32), p["ln_g"], p["ln_b"])
    s = jnp.dot(xn.astype(jnp.bfloat16), p["proj_w"].astype(jnp.bfloat16),
                preferred_element_type=jnp.float32) + p["proj_b"]
    q_bf = s[..., :H].astype(jnp.bfloat16)
    k_bf = s[..., H:].astype(jnp.bfloat16)
    wop = p["o_proj_w"][:H].astype(jnp.bfloat16)
    wod = p["o_proj_w"][H:].astype(jnp.bfloat16)
    prod = k_bf[:, :, None, :] * q_bf[:, None, :, :]               # bf16 (B,i,j,H)
    out = jnp.dot(prod, wop, preferred_element_type=jnp.float32)
    qd = jnp.dot(q_bf, wod, preferred_element_type=jnp.float32) + p["o_proj_b"]
    kd = jnp.dot(k_bf, wod, preferred_element_type=jnp.float32)
    res = out + qd[:, None, :, :] - kd[:, :, None, :]
    return res.astype(out_dtype)


# ----------------------------------- main ------------------------------------ #
if __name__ == "__main__":
    key = jax.random.PRNGKey(0)
    kx, kp = jax.random.split(key)

    B, N, node_dim, edge_dim = 2, 16, 64, 128       # small demo shapes
    node = jax.random.normal(kx, (B, N, node_dim), jnp.float32)
    params = init_node_to_edge_params(kp, node_dim, edge_dim)

    out = jax.block_until_ready(node_to_edge(node, params))
    assert out.shape == (B, N, N, edge_dim)
    assert out.dtype == jnp.bfloat16

    # Tight check against a reference with identical bf16/f32 numerics.
    ref_exact = jax.block_until_ready(ref_node_to_edge_mirrored(node, params))
    assert jnp.allclose(out.astype(jnp.float32), ref_exact.astype(jnp.float32),
                        atol=3e-2, rtol=3e-2), "mismatch vs bf16-mirrored reference"

    # Looser semantic check against the pure-f32 PyTorch-equivalent forward.
    ref_f32 = jax.block_until_ready(ref_node_to_edge_f32(node, params))
    assert jnp.allclose(out.astype(jnp.float32), ref_f32,
                        atol=1e-1, rtol=1e-1), "mismatch vs pure-f32 reference"

    print("KERNEL_OK")
</pallas_src>

<mosaic_0001>
module attributes {stable_mosaic.version = 11 : i64} {
  func.func @_node_to_edge_kernel(%arg0: i32, %arg1: i32, %arg2: memref<1x16x64xf32, #tpu.memory_space<vmem>>, %arg3: memref<1x64xf32, #tpu.memory_space<vmem>>, %arg4: memref<1x64xf32, #tpu.memory_space<vmem>>, %arg5: memref<64x128xbf16, #tpu.memory_space<vmem>>, %arg6: memref<1x128xf32, #tpu.memory_space<vmem>>, %arg7: memref<64x128xbf16, #tpu.memory_space<vmem>>, %arg8: memref<64x128xbf16, #tpu.memory_space<vmem>>, %arg9: memref<1x128xf32, #tpu.memory_space<vmem>>, %arg10: memref<1x16x16x128xbf16, #tpu.memory_space<vmem>>, %arg11: memref<16x64xbf16, #tpu.memory_space<vmem>>, %arg12: memref<16x64xbf16, #tpu.memory_space<vmem>>, %arg13: memref<16x128xf32, #tpu.memory_space<vmem>>, %arg14: memref<16x128xf32, #tpu.memory_space<vmem>>) attributes {dimension_semantics = [#tpu.dimension_semantics<parallel>, #tpu.dimension_semantics<arbitrary>], iteration_bounds = array<i64: 2, 1>, scalar_prefetch = 0 : i64, scratch_operands = 4 : i64, tpu.core_type = #tpu.core_type<tc>, window_params = [{transform_indices = @transform_0, window_bounds = array<i64: 1, 16, 64>}, {pipeline_mode = #tpu.pipeline_mode<synchronous>, transform_indices = @transform_1, window_bounds = array<i64: 1, 64>}, {pipeline_mode = #tpu.pipeline_mode<synchronous>, transform_indices = @transform_2, window_bounds = array<i64: 1, 64>}, {pipeline_mode = #tpu.pipeline_mode<synchronous>, transform_indices = @transform_3, window_bounds = array<i64: 64, 128>}, {pipeline_mode = #tpu.pipeline_mode<synchronous>, transform_indices = @transform_4, window_bounds = array<i64: 1, 128>}, {pipeline_mode = #tpu.pipeline_mode<synchronous>, transform_indices = @transform_5, window_bounds = array<i64: 64, 128>}, {pipeline_mode = #tpu.pipeline_mode<synchronous>, transform_indices = @transform_6, window_bounds = array<i64: 64, 128>}, {pipeline_mode = #tpu.pipeline_mode<synchronous>, transform_indices = @transform_7, window_bounds = array<i64: 1, 128>}, {transform_indices = @transform_8, window_bounds = array<i64: 1, 16, 16, 128>}]} {
    %c0_i32 = arith.constant 0 : i32
    %0 = arith.cmpi eq, %arg1, %c0_i32 : i32
    %1 = arith.extui %0 : i1 to i32
    %c0_i32_0 = arith.constant 0 : i32
    %2 = arith.cmpi ne, %1, %c0_i32_0 : i32
    scf.if %2 {
      %c0_12 = arith.constant 0 : index
      %c0_13 = arith.constant 0 : index
      %c0_14 = arith.constant 0 : index
      %30 = vector.load %arg2[%c0_12, %c0_13, %c0_14] : memref<1x16x64xf32, #tpu.memory_space<vmem>>, vector<1x16x64xf32>
      %31 = vector.shape_cast %30 : vector<1x16x64xf32> to vector<16x64xf32>
      %cst_15 = arith.constant dense<0.000000e+00> : vector<16xf32>
      %32 = vector.multi_reduction <add>, %31, %cst_15 [1] : vector<16x64xf32> to vector<16xf32>
      %33 = vector.shape_cast %32 : vector<16xf32> to vector<16x1xf32>
      %cst_16 = arith.constant 6.400000e+01 : f32
      %34 = vector.broadcast %cst_16 : f32 to vector<16x1xf32>
      %35 = arith.divf %33, %34 : vector<16x1xf32>
      %36 = vector.broadcast %35 : vector<16x1xf32> to vector<16x64xf32>
      %37 = arith.subf %31, %36 : vector<16x64xf32>
      %38 = arith.mulf %37, %37 : vector<16x64xf32>
      %cst_17 = arith.constant dense<0.000000e+00> : vector<16xf32>
      %39 = vector.multi_reduction <add>, %38, %cst_17 [1] : vector<16x64xf32> to vector<16xf32>
      %40 = vector.shape_cast %39 : vector<16xf32> to vector<16x1xf32>
      %cst_18 = arith.constant 6.400000e+01 : f32
      %41 = vector.broadcast %cst_18 : f32 to vector<16x1xf32>
      %42 = arith.divf %40, %41 : vector<16x1xf32>
      %43 = vector.broadcast %35 : vector<16x1xf32> to vector<16x64xf32>
      %44 = arith.subf %31, %43 : vector<16x64xf32>
      %cst_19 = arith.constant 9.99999974E-6 : f32
      %45 = vector.broadcast %cst_19 : f32 to vector<16x1xf32>
      %46 = arith.addf %42, %45 : vector<16x1xf32>
      %47 = math.rsqrt %46 : vector<16x1xf32>
      %48 = vector.broadcast %47 : vector<16x1xf32> to vector<16x64xf32>
      %49 = arith.mulf %44, %48 : vector<16x64xf32>
      %c0_20 = arith.constant 0 : index
      %c0_21 = arith.constant 0 : index
      %50 = vector.load %arg3[%c0_20, %c0_21] : memref<1x64xf32, #tpu.memory_space<vmem>>, vector<1x64xf32>
      %51 = vector.broadcast %50 : vector<1x64xf32> to vector<16x64xf32>
      %52 = arith.mulf %49, %51 : vector<16x64xf32>
      %c0_22 = arith.constant 0 : index
      %c0_23 = arith.constant 0 : index
      %53 = vector.load %arg4[%c0_22, %c0_23] : memref<1x64xf32, #tpu.memory_space<vmem>>, vector<1x64xf32>
      %54 = vector.broadcast %53 : vector<1x64xf32> to vector<16x64xf32>
      %55 = arith.addf %52, %54 : vector<16x64xf32>
      %56 = arith.truncf %55 : vector<16x64xf32> to vector<16x64xbf16>
      %c0_24 = arith.constant 0 : index
      %c0_25 = arith.constant 0 : index
      %57 = vector.load %arg5[%c0_24, %c0_25] : memref<64x128xbf16, #tpu.memory_space<vmem>>, vector<64x128xbf16>
      %cst_26 = arith.constant dense<0.000000e+00> : vector<16x128xf32>
      %58 = tpu.matmul %56, %57, %cst_26 {dimension_numbers = #tpu.dot_dimension_numbers<[1], [0], [0], [1], [0, 0, 1, 1], [], []>} : vector<16x64xbf16>, vector<64x128xbf16>, vector<16x128xf32> -> vector<16x128xf32>
      %c0_27 = arith.constant 0 : index
      %c0_28 = arith.constant 0 : index
      %59 = vector.load %arg6[%c0_27, %c0_28] : memref<1x128xf32, #tpu.memory_space<vmem>>, vector<1x128xf32>
      %60 = vector.broadcast %59 : vector<1x128xf32> to vector<16x128xf32>
      %61 = arith.addf %58, %60 : vector<16x128xf32>
      %62 = vector.extract_strided_slice %61 {offsets = [0, 0], sizes = [16, 64], strides = [1, 1]} : vector<16x128xf32> to vector<16x64xf32>
      %63 = arith.truncf %62 : vector<16x64xf32> to vector<16x64xbf16>
      %64 = vector.extract_strided_slice %61 {offsets = [0, 64], sizes = [16, 64], strides = [1, 1]} : vector<16x128xf32> to vector<16x64xf32>
      %65 = arith.truncf %64 : vector<16x64xf32> to vector<16x64xbf16>
      %c0_29 = arith.constant 0 : index
      %c0_30 = arith.constant 0 : index
      %66 = vector.load %arg11[%c0_29, %c0_30] : memref<16x64xbf16, #tpu.memory_space<vmem>>, vector<16x64xbf16>
      tpu.vector_store %arg11[%c0_29, %c0_30], %63 {strides = array<i32>} : memref<16x64xbf16, #tpu.memory_space<vmem>>, vector<16x64xbf16>,
      %c0_31 = arith.constant 0 : index
      %c0_32 = arith.constant 0 : index
      %67 = vector.load %arg12[%c0_31, %c0_32] : memref<16x64xbf16, #tpu.memory_space<vmem>>, vector<16x64xbf16>
      tpu.vector_store %arg12[%c0_31, %c0_32], %65 {strides = array<i32>} : memref<16x64xbf16, #tpu.memory_space<vmem>>, vector<16x64xbf16>,
      %c0_33 = arith.constant 0 : index
      %c0_34 = arith.constant 0 : index
      %68 = vector.load %arg8[%c0_33, %c0_34] : memref<64x128xbf16, #tpu.memory_space<vmem>>, vector<64x128xbf16>
      %cst_35 = arith.constant dense<0.000000e+00> : vector<16x128xf32>
      %69 = tpu.matmul %63, %68, %cst_35 {dimension_numbers = #tpu.dot_dimension_numbers<[1], [0], [0], [1], [0, 0, 1, 1], [], []>} : vector<16x64xbf16>, vector<64x128xbf16>, vector<16x128xf32> -> vector<16x128xf32>
      %c0_36 = arith.constant 0 : index
      %c0_37 = arith.constant 0 : index
      %70 = vector.load %arg9[%c0_36, %c0_37] : memref<1x128xf32, #tpu.memory_space<vmem>>, vector<1x128xf32>
      %71 = vector.broadcast %70 : vector<1x128xf32> to vector<16x128xf32>
      %72 = arith.addf %69, %71 : vector<16x128xf32>
      %c0_38 = arith.constant 0 : index
      %c0_39 = arith.constant 0 : index
      %73 = vector.load %arg13[%c0_38, %c0_39] : memref<16x128xf32, #tpu.memory_space<vmem>>, vector<16x128xf32>
      tpu.vector_store %arg13[%c0_38, %c0_39], %72 {strides = array<i32>} : memref<16x128xf32, #tpu.memory_space<vmem>>, vector<16x128xf32>,
      %c0_40 = arith.constant 0 : index
      %c0_41 = arith.constant 0 : index
      %74 = vector.load %arg8[%c0_40, %c0_41] : memref<64x128xbf16, #tpu.memory_space<vmem>>, vector<64x128xbf16>
      %cst_42 = arith.constant dense<0.000000e+00> : vector<16x128xf32>
      %75 = tpu.matmul %65, %74, %cst_42 {dimension_numbers = #tpu.dot_dimension_numbers<[1], [0], [0], [1], [0, 0, 1, 1], [], []>} : vector<16x64xbf16>, vector<64x128xbf16>, vector<16x128xf32> -> vector<16x128xf32>
      %c0_43 = arith.constant 0 : index
      %c0_44 = arith.constant 0 : index
      %76 = vector.load %arg14[%c0_43, %c0_44] : memref<16x128xf32, #tpu.memory_space<vmem>>, vector<16x128xf32>
      tpu.vector_store %arg14[%c0_43, %c0_44], %75 {strides = array<i32>} : memref<16x128xf32, #tpu.memory_space<vmem>>, vector<16x128xf32>,
    } else {
    }
    %c16_i32 = arith.constant 16 : i32
    %3 = arith.muli %arg1, %c16_i32 : i32
    %4 = tpu.assume_multiple %3, 16 : i32
    %c0 = arith.constant 0 : index
    %c0_1 = arith.constant 0 : index
    %5 = vector.load %arg11[%c0, %c0_1] : memref<16x64xbf16, #tpu.memory_space<vmem>>, vector<16x64xbf16>
    %6 = arith.index_cast %4 : i32 to index
    %c0_2 = arith.constant 0 : index
    %7 = vector.load %arg12[%6, %c0_2] : memref<16x64xbf16, #tpu.memory_space<vmem>>, vector<16x64xbf16>
    %8 = arith.index_cast %4 : i32 to index
    %c0_3 = arith.constant 0 : index
    %9 = vector.load %arg14[%8, %c0_3] : memref<16x128xf32, #tpu.memory_space<vmem>>, vector<16x128xf32>
    %10 = vector.shape_cast %7 : vector<16x64xbf16> to vector<16x1x64xbf16>
    %11 = vector.shape_cast %5 : vector<16x64xbf16> to vector<1x16x64xbf16>
    %12 = vector.broadcast %10 : vector<16x1x64xbf16> to vector<16x16x64xbf16>
    %13 = vector.broadcast %11 : vector<1x16x64xbf16> to vector<16x16x64xbf16>
    %14 = arith.mulf %12, %13 : vector<16x16x64xbf16>
    %15 = vector.shape_cast %14 : vector<16x16x64xbf16> to vector<256x64xbf16>
    %c0_4 = arith.constant 0 : index
    %c0_5 = arith.constant 0 : index
    %16 = vector.load %arg7[%c0_4, %c0_5] : memref<64x128xbf16, #tpu.memory_space<vmem>>, vector<64x128xbf16>
    %cst = arith.constant dense<0.000000e+00> : vector<256x128xf32>
    %17 = tpu.matmul %15, %16, %cst {dimension_numbers = #tpu.dot_dimension_numbers<[1], [0], [0], [1], [0, 0, 1, 1], [], []>} : vector<256x64xbf16>, vector<64x128xbf16>, vector<256x128xf32> -> vector<256x128xf32>
    %18 = vector.shape_cast %17 : vector<256x128xf32> to vector<16x16x128xf32>
    %c0_6 = arith.constant 0 : index
    %c0_7 = arith.constant 0 : index
    %19 = vector.load %arg13[%c0_6, %c0_7] : memref<16x128xf32, #tpu.memory_space<vmem>>, vector<16x128xf32>
    %20 = vector.shape_cast %19 : vector<16x128xf32> to vector<1x16x128xf32>
    %21 = vector.broadcast %20 : vector<1x16x128xf32> to vector<16x16x128xf32>
    %22 = arith.addf %18, %21 : vector<16x16x128xf32>
    %23 = vector.shape_cast %9 : vector<16x128xf32> to vector<16x1x128xf32>
    %24 = vector.broadcast %23 : vector<16x1x128xf32> to vector<16x16x128xf32>
    %25 = arith.subf %22, %24 : vector<16x16x128xf32>
    %26 = arith.truncf %25 : vector<16x16x128xf32> to vector<16x16x128xbf16>
    %c0_8 = arith.constant 0 : index
    %c0_9 = arith.constant 0 : index
    %c0_10 = arith.constant 0 : index
    %c0_11 = arith.constant 0 : index
    %27 = vector.load %arg10[%c0_8, %c0_9, %c0_10, %c0_11] : memref<1x16x16x128xbf16, #tpu.memory_space<vmem>>, vector<1x16x16x128xbf16>
    %28 = vector.shape_cast %27 : vector<1x16x16x128xbf16> to vector<16x16x128xbf16>
    %29 = vector.shape_cast %26 : vector<16x16x128xbf16> to vector<1x16x16x128xbf16>
    tpu.vector_store %arg10[%c0_8, %c0_9, %c0_10, %c0_11], %29 {strides = array<i32>} : memref<1x16x16x128xbf16, #tpu.memory_space<vmem>>, vector<1x16x16x128xbf16>,
    return
  }
  func.func @transform_0(%arg0: i32, %arg1: i32) -> (i32, i32, i32) {
    %c0_i32 = arith.constant 0 : i32
    %c0_i32_0 = arith.constant 0 : i32
    %c0_i32_1 = arith.constant 0 : i32
    return %arg0, %c0_i32, %c0_i32_0 : i32, i32, i32
  }
  func.func @transform_1(%arg0: i32, %arg1: i32) -> (i32, i32) {
    %c0_i32 = arith.constant 0 : i32
    %c0_i32_0 = arith.constant 0 : i32
    %c0_i32_1 = arith.constant 0 : i32
    return %c0_i32, %c0_i32_0 : i32, i32
  }
  func.func @transform_2(%arg0: i32, %arg1: i32) -> (i32, i32) {
    %c0_i32 = arith.constant 0 : i32
    %c0_i32_0 = arith.constant 0 : i32
    %c0_i32_1 = arith.constant 0 : i32
    return %c0_i32, %c0_i32_0 : i32, i32
  }
  func.func @transform_3(%arg0: i32, %arg1: i32) -> (i32, i32) {
    %c0_i32 = arith.constant 0 : i32
    %c0_i32_0 = arith.constant 0 : i32
    %c0_i32_1 = arith.constant 0 : i32
    return %c0_i32, %c0_i32_0 : i32, i32
  }
  func.func @transform_4(%arg0: i32, %arg1: i32) -> (i32, i32) {
    %c0_i32 = arith.constant 0 : i32
    %c0_i32_0 = arith.constant 0 : i32
    %c0_i32_1 = arith.constant 0 : i32
    return %c0_i32, %c0_i32_0 : i32, i32
  }
  func.func @transform_5(%arg0: i32, %arg1: i32) -> (i32, i32) {
    %c0_i32 = arith.constant 0 : i32
    %c0_i32_0 = arith.constant 0 : i32
    %c0_i32_1 = arith.constant 0 : i32
    return %c0_i32, %c0_i32_0 : i32, i32
  }
  func.func @transform_6(%arg0: i32, %arg1: i32) -> (i32, i32) {
    %c0_i32 = arith.constant 0 : i32
    %c0_i32_0 = arith.constant 0 : i32
    %c0_i32_1 = arith.constant 0 : i32
    return %c0_i32, %c0_i32_0 : i32, i32
  }
  func.func @transform_7(%arg0: i32, %arg1: i32) -> (i32, i32) {
    %c0_i32 = arith.constant 0 : i32
    %c0_i32_0 = arith.constant 0 : i32
    %c0_i32_1 = arith.constant 0 : i32
    return %c0_i32, %c0_i32_0 : i32, i32
  }
  func.func @transform_8(%arg0: i32, %arg1: i32) -> (i32, i32, i32, i32) {
    %c0_i32 = arith.constant 0 : i32
    %c0_i32_0 = arith.constant 0 : i32
    %c0_i32_1 = arith.constant 0 : i32
    return %arg0, %arg1, %c0_i32, %c0_i32_0 : i32, i32, i32, i32
  }
}

</mosaic_0001>

<bundles_post_ra>
// kernel: tpu_custom_call.1
= control target key start
LH: loop header
LB: loop body
LE: loop exit
PB: predicated region body
PF: predicated region fallthrough
CT: control target
= control target key end

     0   :  { %s2993_s0 = inlined_call_operand.hbm [shape: f32[2,16,64], index: 0, kind: input, shape index: {}]   ;;  %s2994_s1 = inlined_call_operand.vmem [shape: f32[1,64], index: 1, kind: input, shape index: {}]   ;;  %s2995_s2 = inlined_call_operand.vmem [shape: f32[1,64], index: 2, kind: input, shape index: {}]   ;;  %s2996_s3 = inlined_call_operand.hbm [shape: bf16[64,128], index: 3, kind: input, shape index: {}]   ;;  %s2997_s4 = inlined_call_operand.vmem [shape: f32[1,128], index: 4, kind: input, shape index: {}]   ;;  %s2998_s5 = inlined_call_operand.hbm [shape: bf16[64,128], index: 5, kind: input, shape index: {}]   ;;  %s2999_s6 = inlined_call_operand.hbm [shape: bf16[64,128], index: 6, kind: input, shape index: {}]   ;;  %s3000_s7 = inlined_call_operand.vmem [shape: f32[1,128], index: 7, kind: input, shape index: {}]   ;;  %s3001_s8 = inlined_call_operand.hbm [shape: bf16[2,16,16,128], index: 8, kind: output, shape index: {}]  }
   0x1   :  { %3009 = sst [smem:[#allocation22_spill]] %s3000_s7 }
   0x2   :  { %3010 = sst [smem:[#allocation23_spill]] %s3001_s8 }
   0x3   :  { %13 = vsyncpa [#allocation7], 0 }
   0x4   :  { %15 = vsyncpa [#allocation7 + $0x1], 0 }
   0x5   :  { %16 = vsyncpa [#allocation10], 0 }
   0x6   :  { %17 = vsyncpa [#allocation13], 0 }
   0x7   :  { %18 = vsyncpa [#allocation8], 0 }
   0x8   :  { %20 = vsyncpa [#allocation8 + $0x1], 0  ;;  %s2492_s27 = smov 0   ;;  %s2494_s28 = smov 0  }
   0x9   :  { %s2496_s29 = smov 0   ;;  %s2498_s30 = smov 0  }
   0xa   :  { %s2500_s9 = smov 0   ;;  %s2502_s10 = smov 0  }
   0xb LB: > { %3011 = sst [smem:[#allocation19_spill]] %s2411_s27  ;;  %s1756_s11 = sadd.s32 4294967295, %s2431_s10   ;;  %s2431_s10 = sphi %s2502_s10, %s26_s10   ;;  %s2427_s9 = sphi %s2500_s9, %s3038_s9   ;;  %s2423_s30 = sphi %s2498_s30, %s3037_s30   ;;  %s2419_s29 = sphi %s2496_s29, %s3036_s29   ;;  %s2415_s28 = sphi %s2494_s28, %s3035_s28   ;;  %s2411_s27 = sphi %s2492_s27, %s3034_s27  }
   0xc   : > { %3012 = sst [smem:[#allocation20_spill]] %s2423_s30  ;;  %s1757_s12 = sadd.s32 4294967294, %s2431_s10  }
   0xd   : > { %p58_p0 = scmp.ne.s32.totalorder %s2415_s28, %s2411_s27  ;;  %p2526_p1 = scmp.eq.s32.totalorder %s1756_s11, 0 }
   0xe   : > { %p2530_p2 = scmp.eq.s32.totalorder %s1756_s11, 1  ;;  %p237_p3 = scmp.eq.s32.totalorder %s1757_s12, 1 }
   0xf   : > { %s3013_s13 = scalar_select %p2526_p1, 1, 0 }
  0x10   : > { %s3014_s14 = scalar_select %p2530_p2, 1, 0 }
  0x11   : > { %p2536_p4 = por %p2526_p1, %p58_p0  ;;  %p1758_p5 = scmp.ge.s32.totalorder %s2431_s10, 1 }
  0x12   : > { %p2541_p6 = por %p237_p3, %p58_p0  ;;  %p244_p7 = scmp.lt.s32.totalorder %s2431_s10, 3 }
  0x13   : > { %s3015_s15 = scalar_select %p2536_p4, 1, 0 }
  0x14   : > { %s3016_s16 = scalar_select %p2541_p6, 1, 0 }
  0x15   : > { %p2546_p8 = pnand %p1758_p5, %p244_p7  ;;  %s2433_s18 = smov [#allocation9]  }
  0x16   : > { %3017 = sst [smem:[#allocation21_spill]] %s3016_s16  ;;  %s262_s19 = sshll.u32 %s2433_s18, 4  ;;  %s2550_s19 = int_to_ptr.vmem [resolvable:$true] %s262_s19 }
  0x17   : > { %s3018_s17 = scalar_select %p2546_p8, 1, 0 }
  0x18   : > { %p2120_p9 = pneg %p2546_p8  ;;  %s2434_s21 = smov [#allocation11]  }
  0x19   : > { %s278_s22 = sshll.u32 %s2434_s21, 4  ;;  %s2435_s23 = smov [#allocation12]   ;;  %s2561_s22 = int_to_ptr.vmem [resolvable:$true] %s278_s22 }
  0x1a   : > { %p2557_p11 = pnand %p2120_p9, %p2526_p1  ;;  %s2563_s24 = sshll.u32 %s2435_s23, 4  ;;  %s292_s24 = int_to_ptr.vmem [resolvable:$true] %s2563_s24 }
  0x1b   : > { %s2227_s11 = scalar_lea.hbm %s2996_s3, 512 }
  0x1c   : > { %p2228_p12 = scmp.ne.s32.totalorder %s2996_s3, %s2227_s11  ;;  %p2573_p13 = pneg %p2557_p11 }
  0x1d   : > { %p2234_p5 = scmp.lt.u32.totalorder %s2227_s11, %s2996_s3 }
  0x1e   : > { %p2230_p0 = pnand %p2573_p13, %p2228_p12 }
  0x20   : > { %p2231_p3 = pneg %p2230_p0 }
  0x22   : > { %p2236_p7 = pnand %p2234_p5, %p2231_p3 }
  0x24   : > { %2239 = shalt.err (!%p2236_p7)
}
  0x25   : > { %s2240_s25 = scalar_lea.vmem %s2550_s19, 512  ;;  %p2248_p1 = scmp.lt.s32.totalorder %s2550_s19, %s2550_s19 }
  0x26   : > { %p2241_p9 = scmp.ne.s32.totalorder %s2550_s19, %s2240_s25  ;;  %p2249_p4 = scmp.lt.s32.totalorder %s2240_s25, %s2240_s25 }
  0x28   : > { %p2243_p10 = pnand %p2241_p9, %p2573_p13  ;;  %p2250_p12 = por %p2249_p4, %p2248_p1 }
  0x2a   : > { %p2244_p6 = pneg %p2243_p10 }
  0x2c   : > { %p2251_p0 = pnand %p2250_p12, %p2244_p6 }
  0x2e   : > { %2254 = shalt.err (!%p2251_p0)
}
  0x2f   : > { %s2436_s26 = smov 64   ;;  %s2437_s11 = smov 4  }
  0x30   : > { %2123 = dma.hbm_to_vmem [thread:$0]  (!%p2557_p11), %s2996_s3, 512, %s2550_s19, [#allocation10], %s2436_s26, %s2436_s26, %s2437_s11  }
  0x31   : > { %s2255_s25 = scalar_lea.hbm %s2998_s5, 512 }
  0x32   : > { %p2256_p1 = scmp.ne.s32.totalorder %s2998_s5, %s2255_s25  ;;  %p2262_p10 = scmp.lt.u32.totalorder %s2255_s25, %s2998_s5 }
  0x34   : > { %p2258_p4 = pnand %p2256_p1, %p2573_p13 }
  0x36   : > { %p2259_p6 = pneg %p2258_p4 }
  0x38   : > { %p2264_p3 = pnand %p2262_p10, %p2259_p6 }
  0x3a   : > { %2267 = shalt.err (!%p2264_p3)
}
  0x3b   : > { %s2268_s19 = scalar_lea.vmem %s2561_s22, 512  ;;  %p2276_p12 = scmp.lt.s32.totalorder %s2561_s22, %s2561_s22 }
  0x3c   : > { %p2269_p5 = scmp.ne.s32.totalorder %s2561_s22, %s2268_s19  ;;  %p2277_p0 = scmp.lt.s32.totalorder %s2268_s19, %s2268_s19 }
  0x3e   : > { %p2271_p7 = pnand %p2269_p5, %p2573_p13  ;;  %p2278_p1 = por %p2277_p0, %p2276_p12 }
  0x40   : > { %p2272_p9 = pneg %p2271_p7 }
  0x42   : > { %p2279_p4 = pnand %p2278_p1, %p2272_p9 }
  0x44   : > { %2282 = shalt.err (!%p2279_p4)
}
  0x45   : > { %2126 = dma.hbm_to_vmem [thread:$0]  (!%p2557_p11), %s2998_s5, 512, %s2561_s22, [#allocation10], %s2436_s26, %s2436_s26, %s2437_s11  }
  0x46   : > { %s2283_s12 = scalar_lea.hbm %s2999_s6, 512 }
  0x47   : > { %p2284_p6 = scmp.ne.s32.totalorder %s2999_s6, %s2283_s12  ;;  %p2290_p5 = scmp.lt.u32.totalorder %s2283_s12, %s2999_s6 }
  0x49   : > { %p2286_p10 = pnand %p2284_p6, %p2573_p13 }
  0x4b   : > { %p2287_p3 = pneg %p2286_p10 }
  0x4d   : > { %p2292_p7 = pnand %p2290_p5, %p2287_p3 }
  0x4f   : > { %2295 = shalt.err (!%p2292_p7)
}
  0x50   : > { %s2296_s19 = scalar_lea.vmem %s292_s24, 512  ;;  %p2304_p1 = scmp.lt.s32.totalorder %s292_s24, %s292_s24 }
  0x51   : > { %p2297_p9 = scmp.ne.s32.totalorder %s292_s24, %s2296_s19  ;;  %p2305_p4 = scmp.lt.s32.totalorder %s2296_s19, %s2296_s19 }
  0x53   : > { %p2299_p12 = pnand %p2297_p9, %p2573_p13  ;;  %p2306_p8 = por %p2305_p4, %p2304_p1 }
  0x55   : > { %p2300_p0 = pneg %p2299_p12 }
  0x57   : > { %p2307_p2 = pnand %p2306_p8, %p2300_p0 }
  0x59   : > { %2310 = shalt.err (!%p2307_p2)
}
  0x5a   : > { %2129 = dma.hbm_to_vmem [thread:$0]  (!%p2557_p11), %s2999_s6, 512, %s292_s24, [#allocation13], %s2436_s26, %s2436_s26, %s2437_s11  }
  0x5b   : > { %s45_s16 = sadd.s32 1, %s2419_s29  ;;  %s38_s20 = sadd.s32 1, %s2427_s9 }
  0x5c   : > { %p52_p2 = scmp.ne.s32.totalorder %s2419_s29, %s2415_s28  ;;  %p40_p8 = scmp.ge.s32.totalorder %s38_s20, 2 }
  0x5d   : > { %p53_p13 = scmp.eq.s32.totalorder %s2431_s10, 0  ;;  %p3021_p6 = scmp.ne.s32.totalorder %s3014_s14, 0 }
  0x5e   : > { %p2141_p3 = scmp.lt.s32.totalorder %s2431_s10, 2  ;;  %s3040_s20 = smov (%p40_p8, %s38_s20), 0 }
  0x5f   : > { %p2652_p10 = por %p3021_p6, %p52_p2  ;;  %p54_p5 = por %p53_p13, %p52_p2 }
  0x60   : > { %s308_s27 = sand.u32 1, %s2419_s29   ;;  %s42_s30 = ssub.s32 %s2427_s9, %s3040_s20 }
  0x61   : > { %p43_p7 = scmp.eq.s32.totalorder %s42_s30, 0  ;;  %s1763_s24 = sshll.u32 %s308_s27, 4 }
  0x62   : > { %s1856_s26 = sshll.u32 %s2427_s9, 8  ;;  %s312_s21 = scalar_lea.vmem [#allocation6], %s1763_s24 }
  0x63   : > { %s2664_s11 = scalar_select %p43_p7, %s2419_s29, %s45_s16  }
  0x64   : > { %s2669_s14 = scalar_lea.hbm %s2993_s0, %s1856_s26  ;;  %s319_s23 = sshll.u32 %s312_s21, 4  ;;  %s2671_s23 = int_to_ptr.vmem [resolvable:$true] %s319_s23 }
  0x65   : > { %p2675_p11 = pnand %p2141_p3, %p54_p5  ;;  %s2679_s19 = scalar_lea.sflag [#allocation7], %s308_s27 }
  0x66   : > { %s2311_s22 = scalar_lea.hbm %s2669_s14, 256  ;;  %s2316_s30 = scalar_lea.hbm %s2993_s0, 512 }
  0x67   : > { %p2312_p9 = scmp.ne.s32.totalorder %s2669_s14, %s2311_s22  ;;  %p2313_p12 = pneg %p2675_p11 }
  0x68   : > { %p2317_p4 = scmp.lt.u32.totalorder %s2669_s14, %s2993_s0  ;;  %p2318_p2 = scmp.lt.u32.totalorder %s2316_s30, %s2311_s22 }
  0x69   : > { %p2314_p0 = pnand %p2313_p12, %p2312_p9  ;;  %p2320_p13 = scmp.lt.u32.totalorder %s2311_s22, %s2669_s14 }
  0x6a   : > { %p2319_p8 = por %p2318_p2, %p2317_p4 }
  0x6b   : > { %p2315_p1 = pneg %p2314_p0 }
  0x6c   : > { %p2321_p6 = por %p2320_p13, %p2319_p8 }
  0x6e   : > { %p2322_p3 = pnand %p2321_p6, %p2315_p1 }
  0x70   : > { %2325 = shalt.err (!%p2322_p3)
}
  0x71   : > { %s2326_s27 = scalar_lea.vmem %s2671_s23, 256  ;;  %s2438_s12 = smov [#allocation6]  }
  0x72   : > { %p2327_p5 = scmp.ne.s32.totalorder %s2671_s23, %s2326_s27  ;;  %s2331_s18 = sshll.u32 %s2438_s12, 4  ;;  %s2332_s18 = int_to_ptr.vmem [resolvable:$false] %s2331_s18 }
  0x73   : > { %s2333_s21 = scalar_lea.vmem %s2332_s18, 512  ;;  %p2334_p0 = scmp.lt.s32.totalorder %s2671_s23, %s2332_s18 }
  0x74   : > { %p2329_p7 = pnand %p2327_p5, %p2313_p12  ;;  %p2335_p4 = scmp.lt.s32.totalorder %s2333_s21, %s2326_s27 }
  0x76   : > { %p2330_p9 = pneg %p2329_p7  ;;  %p2336_p2 = por %p2335_p4, %p2334_p0 }
  0x78   : > { %p2337_p8 = pnand %p2336_p2, %p2330_p9 }
  0x7a   : > { %2340 = shalt.err (!%p2337_p8)
}
  0x7b   : > { %s2439_s22 = smov 128   ;;  %s2440_s7 = smov 8  }
  0x7c   : > { %2133 = dma.hbm_to_vmem [thread:$0]  (!%p2675_p11), %s2669_s14, 256, %s2671_s23, %s2679_s19, %s2439_s22, %s2439_s22, %s2440_s7  }
  0x7d   : > { %p3024_p12 = scmp.ne.s32.totalorder %s3018_s17, 0 }
  0x7e   : > { %s2710_s16 = sand.u32 (!%p3024_p12), 1, %s2415_s28   ;;  %p3025_p1 = scmp.ne.s32.totalorder (!%p3024_p12), %s3015_s15, 0 }
  0x7f   : > { %331 = sbr.rel (%p3024_p12) target bundleno = 1089 (0x441), region = 52  ;;  %s1767_s30 = sshll.u32 (!%p3024_p12), %s2710_s16, 4 }
  0x80   : > { %s334_s24 = scalar_lea.sflag (!%p3024_p12), [#allocation7], %s2710_s16  ;;  %s337_s26 = scalar_lea.vmem (!%p3024_p12), [#allocation6], %s1767_s30 }
  0x86   : > { %2394 = dma.done.wait (%p3025_p1), %s334_s24, 256  }
  0x87   : > { %2396 = vsyncadd (%p3025_p1), %s334_s24, 4294967040  ;;  %p3026_p13 = scmp.ne.s32.totalorder %s3013_s13, 0 }
  0x89   : > { %2398 = dma.done.wait (%p3026_p13), [#allocation10], 1024  }
  0x8a   : > { %2400 = vsyncadd (%p3026_p13), [#allocation10], 4294966272 }
  0x8b   : > { %2402 = dma.done.wait (%p3026_p13), [#allocation13], 512  }
  0x8c   : > { %2404 = vsyncadd (%p3026_p13), [#allocation13], 4294966784  ;;  %vm390_vm0 = vcmask 523264   ;;  %v388_v0 = vld [vmem:[%s337_s26] sm:$0xff]  ;;  %v389_v1 = vld [vmem:[%s337_s26 + $0x8] sm:$0xff]  ;;  %v2441_v15 = vmov 0.0   ;;  %v705_v58 = vlaneseq }
  0x8d   : > { %v391_v2 = vsel %vm390_vm0, %v388_v0, 0.0  ;;  %v394_v3 = vsel %vm390_vm0, %v389_v1, 0.0  ;;  %v2206_v14 = vld [vmem:[#allocation9] sm:$0xff]   ;;  %2020 = vmatprep.subr.bf16.mxu0 %v2441_v15  ;;  %2032 = vmatprep.subr.bf16.mxu1 %v2441_v15  ;;  %v2207_v16 = vld [vmem:[#allocation9 + $0x8] sm:$0xff]   ;;  %v2208_v17 = vld [vmem:[#allocation9 + $0x10] sm:$0xff]   ;;  %vm2442_vm1 = vmmov 0  }
  0x8e   : > { %392 = vadd.xlane.f32.xlu0 %v391_v2  ;;  %2021 = vmatpush3.bf16.msra.mxu0 %v2206_v14  ;;  %v2209_v18 = vld [vmem:[#allocation9 + $0x18] sm:$0xff]   ;;  %v2210_v19 = vld [vmem:[#allocation12] sm:$0xff]   ;;  %v2211_v20 = vld [vmem:[#allocation12 + $0x8] sm:$0xff]   ;;  %s2443_s19 = smov 64   ;;  %v2444_v56 = vmov 1966171168  }
  0x8f   : > { %2022 = vmatprep.subr.bf16.mxu0 %v2441_v15  ;;  %2028 = vmatprep.mubr.msk.bf16.mxu0 %vm2442_vm1, %v2441_v15  ;;  %v1772_v29 = vld [vmem:[%s2994_s1] ss:$0 sm:$0xff]  ;;  %v2213_v39 = vld [vmem:[#allocation12 + $0x18] sm:$0xff]   ;;  %v2214_v40 = vld [vmem:[#allocation12] sm:$0xff]   ;;  %v703_v57 = vunpack.c.l.s4 %v2444_v56  ;;  %v706_v61 = vshrl.u32 %v705_v58, 7  ;;  %s3027_s18 = sld [smem:[#allocation22_spill]] }
  0x90   : > { %2040 = vmatprep.mubr.msk.bf16.mxu1 %vm2442_vm1, %v2441_v15  ;;  %2033 = vmatpush3.bf16.msra.mxu1 %v2210_v19  ;;  %v1773_v33 = vld [vmem:[%s2995_s2] ss:$0 sm:$0xff]  ;;  %v2215_v41 = vld [vmem:[#allocation12 + $0x8] sm:$0xff]   ;;  %v2217_v43 = vld [vmem:[#allocation12 + $0x18] sm:$0xff]   ;;  %s1771_s21 = sshll.u32 %s2710_s16, 7  ;;  %s3028_s7 = sld [smem:[#allocation20_spill]] }
  0x91   : > { %2034 = vmatprep.subr.bf16.mxu1 %v2441_v15  ;;  %v2212_v38 = vld [vmem:[#allocation12 + $0x10] sm:$0xff]   ;;  %v2218_v44 = vld [vmem:[#allocation11] sm:$0xff]   ;;  %v2219_v53 = vld [vmem:[#allocation11 + $0x8] sm:$0xff]   ;;  %v704_v60 = vunpack.c.0.s8 %v703_v57  ;;  %s2865_s22 = scalar_lea.vmem [#allocation14], %s1771_s21  ;;  %s3029_s15 = sld [smem:[#allocation23_spill]] }
  0x92   : > { %395 = vadd.xlane.f32.xlu0 %v394_v3  ;;  %2023 = vmatpush3.bf16.msra.mxu0 %v2207_v16  ;;  %v2216_v42 = vld [vmem:[#allocation12 + $0x10] sm:$0xff]   ;;  %v2221_v55 = vld [vmem:[#allocation11 + $0x18] sm:$0xff]   ;;  %v2752_v3 = vsub.s32 0, %v706_v61  ;;  %s1639_s24 = sshll.u32 %s2865_s22, 4  ;;  %s1623_s14 = scalar_lea.sflag [#allocation8], %s2710_s16  ;;  %s2940_s24 = int_to_ptr.vmem [resolvable:$true] %s1639_s24 }
  0x93   : > { %2024 = vmatprep.subr.bf16.mxu0 %v2441_v15  ;;  %v1774_v45 = vld [vmem:[%s2997_s4] ss:$0 sm:$0xff]  ;;  %v2748_v62 = vsub.s32 %v704_v60, %v706_v61  ;;  %s2341_s23 = scalar_lea.vmem %s2940_s24, 2048  ;;  %s2445_s25 = smov [#allocation14]  }
  0x94   : > { %2035 = vmatpush3.bf16.msra.mxu1 %v2211_v20  ;;  %v2220_v54 = vld [vmem:[#allocation11 + $0x10] sm:$0xff]   ;;  %p2342_p11 = scmp.ne.s32.totalorder %s2940_s24, %s2341_s23  ;;  %s2345_s27 = sshll.u32 %s2445_s25, 4  ;;  %s2346_s27 = int_to_ptr.vmem [resolvable:$false] %s2345_s27 }
  0x95   : > { %2036 = vmatprep.subr.bf16.mxu1 %v2441_v15  ;;  %s2347_s12 = scalar_lea.vmem %s2346_s27, 4096  ;;  %p2348_p5 = scmp.lt.s32.totalorder %s2940_s24, %s2346_s27 }
  0x96   : > { %2025 = vmatpush3.bf16.msra.mxu0 %v2208_v17  ;;  %s1889_s30 = sshll.u32 %s3028_s7, 11  ;;  %p2343_p6 = pnand %p2342_p11, %p2652_p10 }
  0x97   : > { %2026 = vmatprep.subr.bf16.mxu0 %v2441_v15  ;;  %s2938_s17 = scalar_lea.hbm %s3029_s15, %s1889_s30  ;;  %p2349_p7 = scmp.lt.s32.totalorder %s2347_s12, %s2341_s23 }
  0x98   : > { %2037 = vmatpush3.bf16.msra.mxu1 %v2212_v38  ;;  %p2344_p3 = pneg %p2343_p6 }
  0x99   : > { %2038 = vmatprep.subr.bf16.mxu1 %v2441_v15  ;;  %p2350_p9 = por %p2349_p7, %p2348_p5 }
  0x9a   : > { %2027 = vmatpush3.bf16.msra.mxu0 %v2209_v18 }
  0x9b   : > { %2044 = vmatprep.subr.bf16.mxu0 %v2441_v15  ;;  %p2351_p0 = pnand %p2350_p9, %p2344_p3 }
  0x9c   : > { %2039 = vmatpush3.bf16.msra.mxu1 %v2213_v39 }
  0x9d   : > { %2096 = vmatprep.subr.bf16.mxu1 %v2218_v44 }
 0x11b   : > { %v393_v4 = vpop.xlane.xlu0 %392 }
 0x11c   : > { %v398_v5 = vmul.f32 0.015625, %v393_v4 }
 0x11e   : > { %v400_v6 = vsub.f32 %v388_v0, %v398_v5 }
 0x11f   : > { %v396_v7 = vpop.xlane.xlu0 %395 }
 0x120   : > { %v399_v8 = vmul.f32 0.015625, %v396_v7  ;;  %v402_v9 = vmul.f32 %v400_v6, %v400_v6 }
 0x122   : > { %v401_v10 = vsub.f32 %v389_v1, %v399_v8  ;;  %v404_v11 = vsel %vm390_vm0, %v402_v9, 0.0 }
 0x123   : > { %405 = vadd.xlane.f32.xlu1 %v404_v11 }
 0x124   : > { %v403_v12 = vmul.f32 %v401_v10, %v401_v10 }
 0x126   : > { %v407_v13 = vsel %vm390_vm0, %v403_v12, 0.0 }
 0x127   : > { %408 = vadd.xlane.f32.xlu1 %v407_v13 }
 0x1b0   : > { %v406_v21 = vpop.xlane.xlu1 %405 }
 0x1b1   : > { %v410_v22 = vmul.f32 0.015625, %v406_v21 }
 0x1b3   : > { %v412_v23 = vadd.f32 1e-05, %v410_v22 }
 0x1b4   : > { %v409_v24 = vpop.xlane.xlu1 %408 }
 0x1b5   : > { %2223 = vrsqrt.f32 %v412_v23  ;;  %v411_v25 = vmul.f32 0.015625, %v409_v24 }
 0x1b7   : > { %v413_v26 = vadd.f32 1e-05, %v411_v25 }
 0x1b9   : > { %2225 = vrsqrt.f32 %v413_v26 }
 0x1bf   : > { %v2224_v27 = vpop.eup %2223 }
 0x1c0   : > { %v416_v28 = vmul.f32 %v2224_v27, %v400_v6 }
 0x1c2   : > { %v425_v32 = vmul.f32 %v1772_v29, %v416_v28 }
 0x1c3   : > { %v2226_v30 = vpop.eup %2225 }
 0x1c4   : > { %v417_v31 = vmul.f32 %v2226_v30, %v401_v10  ;;  %v434_v35 = vadd.f32 %v1773_v33, %v425_v32 }
 0x1c6   : > { %v426_v34 = vmul.f32 %v1772_v29, %v417_v31 }
 0x1c8   : > { %v435_v36 = vadd.f32 %v1773_v33, %v426_v34 }
 0x1ca   : > { %v436_v37 = vpack.c.bf16 %v435_v36, %v434_v35 }
 0x1cc   : > { %2029 = vmatmul.mubr.msk.bf16.vlgmr.msra.gmra.mrb[0].mxu0 %vm390_vm0, %v436_v37 }
 0x1cd   : > { %2052 = vmatprep.mubr.msk.bf16.mxu0 %vm2442_vm1, %v2441_v15  ;;  %2045 = vmatpush3.bf16.msra.mxu0 %v2214_v40 }
 0x1ce   : > { %2046 = vmatprep.subr.bf16.mxu0 %v2441_v15 }
 0x1d1   : > { %2047 = vmatpush3.bf16.msra.mxu0 %v2215_v41 }
 0x1d2   : > { %2048 = vmatprep.subr.bf16.mxu0 %v2441_v15 }
 0x1d5   : > { %2049 = vmatpush3.bf16.msra.mxu0 %v2216_v42 }
 0x1d6   : > { %2050 = vmatprep.subr.bf16.mxu0 %v2441_v15 }
 0x1d9   : > { %2051 = vmatpush3.bf16.msra.mxu0 %v2217_v43 }
 0x1da   : > { %2056 = vmatprep.subr.bf16.mxu0 %v2218_v44 }
 0x29f   : > { %v513_v46 = vpop.f32.mrb[0].mxu0 }
 0x2a0   : > { %v2030_v47 = vpop.f32.mrb[1].mxu0  ;;  %v514_v49 = vadd.f32 %v1774_v45, %v513_v46 }
 0x2a1   : > { %v516_v48 = vpop.f32.mrb[2].mxu0 }
 0x2a2   : > { %v517_v50 = vadd.f32 %v1774_v45, %v516_v48  ;;  %v2031_v51 = vpop.f32.mrb[3].mxu0 }
 0x2a4   : > { %v520_v52 = vpack.c.bf16 %v517_v50, %v514_v49 }
 0x2a6   : > { %521 = vst.msk [vmem:[#allocation2] sm:$0xff] %vm390_vm0, %v520_v52  ;;  %523 = vrot.lane.b32.xlu0 %v520_v52, %s2443_s19  ;;  %2041 = vmatmul.mubr.msk.bf16.vlgmr.msra.gmra.mrb[0].mxu1 %vm390_vm0, %v520_v52 }
 0x2a7   : > { %2100 = vmatpush3.bf16.msra.mxu1 %v2218_v44 }
 0x2a8   : > { %2097 = vmatprep.subr.bf16.mxu1 %v2219_v53 }
 0x2ab   : > { %2101 = vmatpush3.bf16.msra.mxu1 %v2219_v53 }
 0x2ac   : > { %2098 = vmatprep.subr.bf16.mxu1 %v2220_v54 }
 0x2ad   : > { %v2762_v31 = vld [vmem:[#allocation2] sm:$0xff] }
 0x2af   : > { %2102 = vmatpush3.bf16.msra.mxu1 %v2220_v54 }
 0x2b0   : > { %2099 = vmatprep.subr.bf16.mxu1 %v2221_v55 }
 0x2b3   : > { %2103 = vmatpush3.bf16.msra.mxu1 %v2221_v55 }
 0x318   : > { %v524_v59 = vpop.permute.xlu0 %523 }
 0x319   : > { %526 = vst.msk [vmem:[#allocation3] sm:$0xff] %vm390_vm0, %v524_v59  ;;  %2053 = vmatmul.mubr.msk.bf16.vlgmr.msra.gmra.mrb[4].mxu0 %vm390_vm0, %v524_v59 }
 0x31a   : > { %2057 = vmatpush3.bf16.msra.mxu0 %v2218_v44 }
 0x31b   : > { %2058 = vmatprep.subr.bf16.mxu0 %v2219_v53 }
 0x31e   : > { %2059 = vmatpush3.bf16.msra.mxu0 %v2219_v53 }
 0x31f   : > { %2060 = vmatprep.subr.bf16.mxu0 %v2220_v54 }
 0x320   : > { %v696_v63 = vld [vmem:[#allocation3] sm:$0xff] }
 0x321   : > { %v708_v0 = vrot.slane %v696_v63, %v2748_v62  ;;  %v701_v1 = vcombine.high %v696_v63, %v696_v63 }
 0x322   : > { %2061 = vmatpush3.bf16.msra.mxu0 %v2220_v54 }
 0x323   : > { %2062 = vmatprep.subr.bf16.mxu0 %v2221_v55  ;;  %v724_v2 = vrot.slane %v708_v0, %v2748_v62  ;;  %v716_v4 = vcombine.high %v708_v0, %v708_v0  ;;  %v715_v5 = vrot.slane %v701_v1, %v2748_v62 }
 0x325   : > { %v1791_v6 = vpack.i.b16 %v724_v2, %v724_v2  ;;  %v751_v7 = vunpack.i.h.s16 %v724_v2  ;;  %v738_v8 = vrot.slane %v716_v4, %v2748_v62  ;;  %v731_v9 = vrot.slane %v715_v5, %v2748_v62 }
 0x326   : > { %2063 = vmatpush3.bf16.msra.mxu0 %v2221_v55  ;;  %v746_v10 = vcombine.high %v724_v2, %v724_v2  ;;  %v717_v18 = vcombine.high %v715_v5, %v715_v5 }
 0x327   : > { %v785_v11 = vrot.slane %v1791_v6, %v2752_v3  ;;  %v767_v12 = vpack.i.b16 %v751_v7, %v751_v7  ;;  %v1792_v13 = vpack.i.b16 %v738_v8, %v738_v8  ;;  %v748_v14 = vcombine.high %v738_v8, %v738_v8 }
 0x328   : > { %v1795_v15 = vpack.i.b16 %v731_v9, %v731_v9  ;;  %v753_v16 = vunpack.i.h.s16 %v738_v8  ;;  %v1793_v17 = vpack.i.b16 %v746_v10, %v746_v10  ;;  %v759_v26 = vunpack.i.h.s16 %v731_v9 }
 0x329   : > { %v847_v19 = vpack.i.b16 %v785_v11, %v785_v11  ;;  %v789_v20 = vrot.slane %v767_v12, %v2752_v3  ;;  %v793_v21 = vrot.slane %v1792_v13, %v2752_v3  ;;  %v757_v22 = vunpack.i.h.s16 %v748_v14 }
 0x32a   : > { %v1794_v23 = vpack.i.b16 %v748_v14, %v748_v14  ;;  %v817_v24 = vrot.slane %v1795_v15, %v2752_v3  ;;  %v769_v25 = vpack.i.b16 %v753_v16, %v753_v16  ;;  %v801_v35 = vrot.slane %v1793_v17, %v2752_v3 }
 0x32b   : > { %v852_v27 = vrot.slane %v847_v19, %v2752_v3  ;;  %v854_v28 = vpack.i.b16 %v789_v20, %v789_v20  ;;  %v861_v29 = vpack.i.b16 %v793_v21, %v793_v21  ;;  %v773_v30 = vpack.i.b16 %v757_v22, %v757_v22 }
 0x32c   : > { %v809_v32 = vrot.slane %v1794_v23, %v2752_v3  ;;  %v903_v33 = vpack.i.b16 %v817_v24, %v817_v24  ;;  %v797_v34 = vrot.slane %v769_v25, %v2752_v3  ;;  %v775_v45 = vpack.i.b16 %v759_v26, %v759_v26 }
 0x32d   : > { %v958_v36 = vmul.bf16 %v852_v27, %v2762_v31  ;;  %v859_v37 = vrot.slane %v854_v28, %v2752_v3  ;;  %v866_v38 = vrot.slane %v861_v29, %v2752_v3  ;;  %v813_v39 = vrot.slane %v773_v30, %v2752_v3 }
 0x32e   : > { %v889_v40 = vpack.i.b16 %v809_v32, %v809_v32  ;;  %v868_v41 = vpack.i.b16 %v797_v34, %v797_v34  ;;  %v908_v47 = vrot.slane %v903_v33, %v2752_v3  ;;  %v875_v48 = vpack.i.b16 %v801_v35, %v801_v35 }
 0x32f   : > { %2064 = vmatprep.mubr.msk.bf16.mxu0 %vm390_vm0, %v958_v36  ;;  %v959_v42 = vmul.bf16 %v859_v37, %v2762_v31  ;;  %v960_v43 = vmul.bf16 %v866_v38, %v2762_v31  ;;  %v896_v44 = vpack.i.b16 %v813_v39, %v813_v39  ;;  %v821_v50 = vrot.slane %v775_v45, %v2752_v3 }
 0x330   : > { %v894_v46 = vrot.slane %v889_v40, %v2752_v3  ;;  %v745_v51 = vrot.slane %v717_v18, %v2748_v62  ;;  %v755_v52 = vunpack.i.h.s16 %v746_v10  ;;  %v873_v54 = vrot.slane %v868_v41, %v2752_v3 }
 0x331   : > { %2065 = vmatmul.mubr.msk.bf16.vlgmr.msra.gmra.mrb[8].mxu0 %vm390_vm0, %v959_v42  ;;  %v901_v49 = vrot.slane %v896_v44, %v2752_v3  ;;  %v747_v55 = vcombine.high %v731_v9, %v731_v9  ;;  %v910_v57 = vpack.i.b16 %v821_v50, %v821_v50  ;;  %v966_v60 = vmul.bf16 %v908_v47, %v2762_v31 }
 0x332   : > { %2068 = vmatprep.mubr.msk.bf16.mxu0 %vm390_vm0, %v960_v43  ;;  %v964_v53 = vmul.bf16 %v894_v46, %v2762_v31  ;;  %v1796_v58 = vpack.i.b16 %v745_v51, %v745_v51  ;;  %v771_v59 = vpack.i.b16 %v755_v52, %v755_v52  ;;  %v880_v61 = vrot.slane %v875_v48, %v2752_v3 }
 0x333   : > { %v965_v56 = vmul.bf16 %v901_v49, %v2762_v31  ;;  %v761_v63 = vunpack.i.h.s16 %v745_v51  ;;  %v1797_v0 = vpack.i.b16 %v747_v55, %v747_v55  ;;  %v961_v4 = vmul.bf16 %v873_v54, %v2762_v31 }
 0x334   : > { %2076 = vmatprep.mubr.msk.bf16.mxu1 %vm390_vm0, %v964_v53  ;;  %v825_v1 = vrot.slane %v1796_v58, %v2752_v3  ;;  %v805_v2 = vrot.slane %v771_v59, %v2752_v3  ;;  %v915_v6 = vrot.slane %v910_v57, %v2752_v3  ;;  %v763_v9 = vunpack.i.h.s16 %v747_v55 }
 0x335   : > { %2077 = vmatmul.mubr.msk.bf16.vlgmr.msra.gmra.mrb[4].mxu1 %vm390_vm0, %v965_v56  ;;  %v777_v5 = vpack.i.b16 %v761_v63, %v761_v63  ;;  %v962_v10 = vmul.bf16 %v880_v61, %v2762_v31  ;;  %v833_v12 = vrot.slane %v1797_v0, %v2752_v3  ;;  %v749_v13 = vcombine.high %v745_v51, %v745_v51 }
 0x336   : > { %2080 = vmatprep.mubr.msk.bf16.mxu1 %vm390_vm0, %v966_v60  ;;  %v917_v7 = vpack.i.b16 %v825_v1, %v825_v1  ;;  %v882_v8 = vpack.i.b16 %v805_v2, %v805_v2  ;;  %v967_v15 = vmul.bf16 %v915_v6, %v2762_v31  ;;  %v779_v18 = vpack.i.b16 %v763_v9, %v763_v9 }
 0x337   : > { %v829_v11 = vrot.slane %v777_v5, %v2752_v3  ;;  %v931_v20 = vpack.i.b16 %v833_v12, %v833_v12  ;;  %v1798_v21 = vpack.i.b16 %v749_v13, %v749_v13  ;;  %v765_v25 = vunpack.i.h.s16 %v749_v13 }
 0x338   : > { %v922_v14 = vrot.slane %v917_v7, %v2752_v3  ;;  %v887_v16 = vrot.slane %v882_v8, %v2752_v3  ;;  %v837_v24 = vrot.slane %v779_v18, %v2752_v3 }
 0x339   : > { %2069 = vmatmul.mubr.msk.bf16.gmra.mrb[12].mxu0 %vm390_vm0, %v961_v4  ;;  %v924_v17 = vpack.i.b16 %v829_v11, %v829_v11  ;;  %v936_v26 = vrot.slane %v931_v20, %v2752_v3  ;;  %v841_v27 = vrot.slane %v1798_v21, %v2752_v3  ;;  %v781_v30 = vpack.i.b16 %v765_v25, %v765_v25 }
 0x33a   : > { %2072 = vmatprep.mubr.msk.bf16.mxu0 %vm390_vm0, %v962_v10  ;;  %v968_v19 = vmul.bf16 %v922_v14, %v2762_v31  ;;  %v963_v22 = vmul.bf16 %v887_v16, %v2762_v31  ;;  %v938_v29 = vpack.i.b16 %v837_v24, %v837_v24 }
 0x33b   : > { %v929_v23 = vrot.slane %v924_v17, %v2752_v3  ;;  %v970_v32 = vmul.bf16 %v936_v26, %v2762_v31  ;;  %v945_v33 = vpack.i.b16 %v841_v27, %v841_v27  ;;  %v845_v35 = vrot.slane %v781_v30, %v2752_v3 }
 0x33c   : > { %v943_v34 = vrot.slane %v938_v29, %v2752_v3 }
 0x33d   : > { %2081 = vmatmul.mubr.msk.bf16.gmra.mrb[8].mxu1 %vm390_vm0, %v967_v15  ;;  %v969_v28 = vmul.bf16 %v929_v23, %v2762_v31  ;;  %v950_v36 = vrot.slane %v945_v33, %v2752_v3  ;;  %v952_v38 = vpack.i.b16 %v845_v35, %v845_v35 }
 0x33e   : > { %2084 = vmatprep.mubr.msk.bf16.mxu1 %vm390_vm0, %v968_v19  ;;  %v971_v37 = vmul.bf16 %v943_v34, %v2762_v31 }
 0x33f   : > { %v972_v39 = vmul.bf16 %v950_v36, %v2762_v31  ;;  %v957_v40 = vrot.slane %v952_v38, %v2752_v3 }
 0x341   : > { %2073 = vmatmul.mubr.msk.bf16.gmra.mrb[16].mxu0 %vm390_vm0, %v963_v22  ;;  %v973_v41 = vmul.bf16 %v957_v40, %v2762_v31  ;;  %v1780_v31 = vld [vmem:[%s3027_s18] ss:$0 sm:$0xff] }
 0x345   : > { %2085 = vmatmul.mubr.msk.bf16.gmra.mrb[12].mxu1 %vm390_vm0, %v969_v28 }
 0x346   : > { %2088 = vmatprep.mubr.msk.bf16.mxu1 %vm390_vm0, %v970_v32 }
 0x34d   : > { %2089 = vmatmul.mubr.msk.bf16.gmra.mrb[16].mxu1 %vm390_vm0, %v971_v37 }
 0x34e   : > { %2092 = vmatprep.mubr.msk.bf16.mxu1 %vm390_vm0, %v972_v39 }
 0x355   : > { %2093 = vmatmul.mubr.msk.bf16.gmra.mrb[20].mxu1 %vm390_vm0, %v973_v41 }
 0x379   : > { %v603_v42 = vpop.f32.mrb[0].mxu1 }
 0x37a   : > { %v2042_v43 = vpop.f32.mrb[1].mxu1  ;;  %v2839_v59 = vadd.f32 %v1780_v31, %v603_v42 }
 0x37b   : > { %v606_v44 = vpop.f32.mrb[2].mxu1 }
 0x37c   : > { %v2043_v45 = vpop.f32.mrb[3].mxu1  ;;  %v2843_v63 = vadd.f32 %v1780_v31, %v606_v44 }
 0x3ec   : > { %v681_v46 = vpop.f32.mrb[4].mxu0 }
 0x3ed   : > { %v2054_v47 = vpop.f32.mrb[5].mxu0  ;;  %v1252_v50 = vcombine.high %v681_v46, %v681_v46  ;;  %v1259_v51 = vrot.slane %v681_v46, %v2748_v62 }
 0x3ee   : > { %v2824_v48 = vpop.f32.mrb[6].mxu0 }
 0x3ef   : > { %v2055_v49 = vpop.f32.mrb[7].mxu0  ;;  %v1266_v52 = vrot.slane %v1252_v50, %v2748_v62  ;;  %v1267_v53 = vcombine.high %v1259_v51, %v1259_v51  ;;  %v1275_v57 = vrot.slane %v1259_v51, %v2748_v62  ;;  %v1308_v60 = vrot.slane %v2824_v48, %v2748_v62 }
 0x3f0   : > { %v1301_v50 = vcombine.high %v2824_v48, %v2824_v48 }
 0x3f1   : > { %v1268_v54 = vcombine.high %v1266_v52, %v1266_v52  ;;  %v1289_v55 = vrot.slane %v1267_v53, %v2748_v62  ;;  %v2837_v58 = vrot.slane %v1266_v52, %v2748_v62  ;;  %v1353_v6 = vrot.slane %v1275_v57, %v2752_v3 }
 0x3f2   : > { %v1316_v12 = vcombine.high %v1308_v60, %v1308_v60  ;;  %v1297_v21 = vcombine.high %v1275_v57, %v1275_v57  ;;  %v2871_v40 = vrot.slane %v1308_v60, %v2748_v62 }
 0x3f3   : > { %v2833_v56 = vrot.slane %v1268_v54, %v2748_v62  ;;  %v1357_v1 = vrot.slane %v1289_v55, %v2752_v3  ;;  %v1298_v8 = vcombine.high %v2837_v58, %v2837_v58  ;;  %v1299_v20 = vcombine.high %v1289_v55, %v1289_v55 }
 0x3f4   : > { %v2863_v35 = vrot.slane %v1316_v12, %v2748_v62  ;;  %v1361_v43 = vrot.slane %v1297_v21, %v2752_v3  ;;  %v1385_v48 = vrot.slane %v2871_v40, %v2752_v3 }
 0x3f5   : > { %v1300_v4 = vcombine.high %v2833_v56, %v2833_v56  ;;  %v1377_v24 = vrot.slane %v1298_v8, %v2752_v3  ;;  %v1365_v38 = vrot.slane %v1299_v20, %v2752_v3  ;;  %v1369_v20 = vrot.slane %v2837_v58, %v2752_v3 }
 0x3f6   : > { %v1389_v57 = vrot.slane %v2863_v35, %v2752_v3 }
 0x3f7   : > { %v1381_v18 = vrot.slane %v1300_v4, %v2752_v3 }
 0x404   : > { %v2066_v61 = vpop.f32.mrb[8].mxu0 }
 0x405   : > { %v1220_v0 = vadd.f32 %v2066_v61, %v2839_v59  ;;  %v1089_v2 = vpop.f32.mrb[9].mxu0 }
 0x406   : > { %v1218_v5 = vadd.f32 %v1089_v2, %v2839_v59  ;;  %v2067_v7 = vpop.f32.mrb[10].mxu0 }
 0x407   : > { %v1432_v9 = vsub.f32 %v1220_v0, %v1357_v1  ;;  %v1221_v10 = vadd.f32 %v2067_v7, %v2843_v63  ;;  %v1092_v11 = vpop.f32.mrb[11].mxu0  ;;  %v1315_v7 = vrot.slane %v1301_v50, %v2748_v62 }
 0x408   : > { %v1430_v13 = vsub.f32 %v1218_v5, %v1353_v6  ;;  %v1219_v14 = vadd.f32 %v1092_v11, %v2843_v63  ;;  %v2078_v15 = vpop.f32.mrb[4].mxu1 }
 0x409   : > { %v1433_v16 = vsub.f32 %v1221_v10, %v1357_v1  ;;  %v1232_v17 = vadd.f32 %v2078_v15, %v2839_v59  ;;  %v1137_v19 = vpop.f32.mrb[5].mxu1 }
 0x40a   : > { %v1431_v22 = vsub.f32 %v1219_v14, %v1353_v6  ;;  %v1230_v23 = vadd.f32 %v1137_v19, %v2839_v59  ;;  %v2079_v25 = vpop.f32.mrb[6].mxu1  ;;  %v1373_v14 = vrot.slane %v2833_v56, %v2752_v3 }
 0x40b   : > { %v1898_v26 = vpack.c.bf16 %v1433_v16, %v1432_v9  ;;  %v1444_v27 = vsub.f32 %v1232_v17, %v1381_v18  ;;  %v1233_v28 = vadd.f32 %v2079_v25, %v2843_v63  ;;  %v1140_v29 = vpop.f32.mrb[7].mxu1  ;;  %v1348_v16 = vcombine.high %v2863_v35, %v2863_v35 }
 0x40c   : > { %v1893_v30 = vpack.c.bf16 %v1431_v22, %v1430_v13  ;;  %v1442_v32 = vsub.f32 %v1230_v23, %v1377_v24  ;;  %v1231_v33 = vadd.f32 %v1140_v29, %v2843_v63  ;;  %v2070_v34 = vpop.f32.mrb[12].mxu0  ;;  %v1346_v17 = vcombine.high %v2871_v40, %v2871_v40 }
 0x40d   : > { %1970 = vst [vmem:[%s2865_s22 + $0x8] sm:$0xff] %v1898_v26   ;;  %v1445_v36 = vsub.f32 %v1233_v28, %v1381_v18  ;;  %v1224_v37 = vadd.f32 %v2070_v34, %v2839_v59  ;;  %v1105_v39 = vpop.f32.mrb[13].mxu0  ;;  %v1317_v29 = vcombine.high %v1315_v7, %v1315_v7  ;;  %v1397_v58 = vrot.slane %v1348_v16, %v2752_v3 }
 0x40e   : > { %1894 = vst [vmem:[%s2865_s22] sm:$0xff] %v1893_v30   ;;  %v1443_v41 = vsub.f32 %v1231_v33, %v1377_v24  ;;  %v1222_v42 = vadd.f32 %v1105_v39, %v2839_v59  ;;  %v2071_v44 = vpop.f32.mrb[14].mxu0 }
 0x40f   : > { %v1928_v45 = vpack.c.bf16 %v1445_v36, %v1444_v27  ;;  %v1436_v46 = vsub.f32 %v1224_v37, %v1365_v38  ;;  %v1225_v47 = vadd.f32 %v2071_v44, %v2843_v63  ;;  %v1108_v49 = vpop.f32.mrb[15].mxu0  ;;  %v1393_v36 = vrot.slane %v1346_v17, %v2752_v3 }
 0x410   : > { %v1923_v51 = vpack.c.bf16 %v1443_v41, %v1442_v32  ;;  %v1434_v52 = vsub.f32 %v1222_v42, %v1361_v43  ;;  %v1223_v53 = vadd.f32 %v1108_v49, %v2843_v63  ;;  %v2082_v54 = vpop.f32.mrb[8].mxu1 }
 0x411   : > { %1976 = vst [vmem:[%s2865_s22 + $0x38] sm:$0xff] %v1928_v45   ;;  %v1437_v31 = vsub.f32 %v1225_v47, %v1365_v38  ;;  %v1236_v55 = vadd.f32 %v2082_v54, %v2839_v59  ;;  %v1153_v60 = vpop.f32.mrb[9].mxu1  ;;  %v1331_v47 = vrot.slane %v1315_v7, %v2748_v62 }
 0x412   : > { %1975 = vst [vmem:[%s2865_s22 + $0x30] sm:$0xff] %v1923_v51   ;;  %v1435_v61 = vsub.f32 %v1223_v53, %v1361_v43  ;;  %v1234_v0 = vadd.f32 %v1153_v60, %v2839_v59  ;;  %v2083_v1 = vpop.f32.mrb[10].mxu1 }
 0x413   : > { %v1908_v2 = vpack.c.bf16 %v1437_v31, %v1436_v46  ;;  %v1448_v4 = vsub.f32 %v1236_v55, %v1389_v57  ;;  %v1237_v5 = vadd.f32 %v2083_v1, %v2843_v63  ;;  %v1156_v6 = vpop.f32.mrb[11].mxu1  ;;  %v1345_v46 = vrot.slane %v1317_v29, %v2748_v62 }
 0x414   : > { %v1903_v8 = vpack.c.bf16 %v1435_v61, %v1434_v52  ;;  %v1446_v9 = vsub.f32 %v1234_v0, %v1385_v48  ;;  %v1235_v10 = vadd.f32 %v1156_v6, %v2843_v63  ;;  %v2074_v11 = vpop.f32.mrb[16].mxu0  ;;  %v1347_v6 = vcombine.high %v1331_v47, %v1331_v47 }
 0x415   : > { %1972 = vst [vmem:[%s2865_s22 + $0x18] sm:$0xff] %v1908_v2   ;;  %v1449_v12 = vsub.f32 %v1237_v5, %v1389_v57  ;;  %v1228_v13 = vadd.f32 %v2074_v11, %v2839_v59  ;;  %v1121_v15 = vpop.f32.mrb[17].mxu0  ;;  %v1405_v54 = vrot.slane %v1345_v46, %v2752_v3  ;;  %v1401_v57 = vrot.slane %v1331_v47, %v2752_v3 }
 0x416   : > { %1971 = vst [vmem:[%s2865_s22 + $0x10] sm:$0xff] %v1903_v8   ;;  %v1447_v18 = vsub.f32 %v1235_v10, %v1385_v48  ;;  %v1226_v19 = vadd.f32 %v1121_v15, %v2839_v59  ;;  %v2075_v21 = vpop.f32.mrb[18].mxu0 }
 0x417   : > { %v1938_v22 = vpack.c.bf16 %v1449_v12, %v1448_v4  ;;  %v1440_v23 = vsub.f32 %v1228_v13, %v1373_v14  ;;  %v1229_v56 = vadd.f32 %v2075_v21, %v2843_v63  ;;  %v1124_v24 = vpop.f32.mrb[19].mxu0  ;;  %v1349_v4 = vcombine.high %v1345_v46, %v1345_v46 }
 0x418   : > { %v1933_v25 = vpack.c.bf16 %v1447_v18, %v1446_v9  ;;  %v1438_v26 = vsub.f32 %v1226_v19, %v1369_v20  ;;  %v1227_v27 = vadd.f32 %v1124_v24, %v2843_v63  ;;  %v2086_v28 = vpop.f32.mrb[12].mxu1 }
 0x419   : > { %1978 = vst [vmem:[%s2865_s22 + $0x48] sm:$0xff] %v1938_v22   ;;  %v1441_v30 = vsub.f32 %v1229_v56, %v1373_v14  ;;  %v1240_v32 = vadd.f32 %v2086_v28, %v2839_v59  ;;  %v1169_v33 = vpop.f32.mrb[13].mxu1  ;;  %v1413_v11 = vrot.slane %v1349_v4, %v2752_v3  ;;  %v1409_v14 = vrot.slane %v1347_v6, %v2752_v3 }
 0x41a   : > { %1977 = vst [vmem:[%s2865_s22 + $0x40] sm:$0xff] %v1933_v25   ;;  %v1439_v34 = vsub.f32 %v1227_v27, %v1369_v20  ;;  %v1238_v35 = vadd.f32 %v1169_v33, %v2839_v59  ;;  %v2087_v37 = vpop.f32.mrb[14].mxu1 }
 0x41b   : > { %v1918_v38 = vpack.c.bf16 %v1441_v30, %v1440_v23  ;;  %v1452_v39 = vsub.f32 %v1240_v32, %v1397_v58  ;;  %v1241_v40 = vadd.f32 %v2087_v37, %v2843_v63  ;;  %v1172_v41 = vpop.f32.mrb[15].mxu1 }
 0x41c   : > { %v1913_v42 = vpack.c.bf16 %v1439_v34, %v1438_v26  ;;  %v1450_v43 = vsub.f32 %v1238_v35, %v1393_v36  ;;  %v1239_v44 = vadd.f32 %v1172_v41, %v2843_v63 }
 0x41d   : > { %1974 = vst [vmem:[%s2865_s22 + $0x28] sm:$0xff] %v1918_v38   ;;  %v1453_v45 = vsub.f32 %v1241_v40, %v1397_v58 }
 0x41e   : > { %1973 = vst [vmem:[%s2865_s22 + $0x20] sm:$0xff] %v1913_v42   ;;  %v1451_v49 = vsub.f32 %v1239_v44, %v1393_v36 }
 0x41f   : > { %v1948_v50 = vpack.c.bf16 %v1453_v45, %v1452_v39 }
 0x420   : > { %v1943_v51 = vpack.c.bf16 %v1451_v49, %v1450_v43  ;;  %v2090_v52 = vpop.f32.mrb[16].mxu1 }
 0x421   : > { %1980 = vst [vmem:[%s2865_s22 + $0x58] sm:$0xff] %v1948_v50   ;;  %v1244_v53 = vadd.f32 %v2090_v52, %v2839_v59  ;;  %v1185_v31 = vpop.f32.mrb[17].mxu1 }
 0x422   : > { %1979 = vst [vmem:[%s2865_s22 + $0x50] sm:$0xff] %v1943_v51   ;;  %v1242_v55 = vadd.f32 %v1185_v31, %v2839_v59  ;;  %v2091_v60 = vpop.f32.mrb[18].mxu1 }
 0x423   : > { %v1456_v61 = vsub.f32 %v1244_v53, %v1405_v54  ;;  %v1245_v62 = vadd.f32 %v2091_v60, %v2843_v63  ;;  %v1188_v0 = vpop.f32.mrb[19].mxu1 }
 0x424   : > { %v1454_v48 = vsub.f32 %v1242_v55, %v1401_v57  ;;  %v1243_v1 = vadd.f32 %v1188_v0, %v2843_v63 }
 0x425   : > { %v1457_v2 = vsub.f32 %v1245_v62, %v1405_v54 }
 0x426   : > { %v1455_v5 = vsub.f32 %v1243_v1, %v1401_v57 }
 0x427   : > { %v1958_v7 = vpack.c.bf16 %v1457_v2, %v1456_v61 }
 0x428   : > { %v1953_v8 = vpack.c.bf16 %v1455_v5, %v1454_v48  ;;  %v2094_v9 = vpop.f32.mrb[20].mxu1 }
 0x429   : > { %1982 = vst [vmem:[%s2865_s22 + $0x68] sm:$0xff] %v1958_v7   ;;  %v1248_v10 = vadd.f32 %v2094_v9, %v2839_v59  ;;  %v1201_v12 = vpop.f32.mrb[21].mxu1 }
 0x42a   : > { %1981 = vst [vmem:[%s2865_s22 + $0x60] sm:$0xff] %v1953_v8   ;;  %v1246_v13 = vadd.f32 %v1201_v12, %v2839_v59  ;;  %v2095_v15 = vpop.f32.mrb[22].mxu1 }
 0x42b   : > { %v1460_v16 = vsub.f32 %v1248_v10, %v1413_v11  ;;  %v1249_v17 = vadd.f32 %v2095_v15, %v2843_v63  ;;  %v1204_v18 = vpop.f32.mrb[23].mxu1 }
 0x42c   : > { %v1458_v19 = vsub.f32 %v1246_v13, %v1409_v14  ;;  %v1247_v20 = vadd.f32 %v1204_v18, %v2843_v63 }
 0x42d   : > { %v1461_v21 = vsub.f32 %v1249_v17, %v1413_v11 }
 0x42e   : > { %v1459_v22 = vsub.f32 %v1247_v20, %v1409_v14 }
 0x42f   : > { %v1968_v23 = vpack.c.bf16 %v1461_v21, %v1460_v16 }
 0x430   : > { %v1963_v3 = vpack.c.bf16 %v1459_v22, %v1458_v19 }
 0x431   : > { %1984 = vst [vmem:[%s2865_s22 + $0x78] sm:$0xff] %v1968_v23  }
 0x432   : > { %1983 = vst [vmem:[%s2865_s22 + $0x70] sm:$0xff] %v1963_v3  }
 0x433   : > { %2354 = shalt.err (!%p2351_p0)
}
 0x434   : > { %s2355_s18 = scalar_lea.hbm %s2938_s17, 2048  ;;  %s2359_s7 = scalar_lea.hbm %s3029_s15, 4096 }
 0x435   : > { %p2356_p4 = scmp.ne.s32.totalorder %s2938_s17, %s2355_s18  ;;  %p2360_p12 = scmp.lt.u32.totalorder %s2938_s17, %s3029_s15 }
 0x436   : > { %p2361_p1 = scmp.lt.u32.totalorder %s2359_s7, %s2355_s18  ;;  %p2363_p11 = scmp.lt.u32.totalorder %s2355_s18, %s2938_s17 }
 0x437   : > { %p2357_p2 = pnand %p2356_p4, %p2652_p10 }
 0x438   : > { %p2362_p13 = por %p2361_p1, %p2360_p12 }
 0x439   : > { %p2358_p8 = pneg %p2357_p2 }
 0x43a   : > { %p2364_p6 = por %p2363_p11, %p2362_p13 }
 0x43c   : > { %p2365_p3 = pnand %p2364_p6, %p2358_p8 }
 0x43e   : > { %2368 = shalt.err (!%p2365_p3)
}
 0x43f   : > { %s2446_s13 = smov 4  }
 0x440   : > { %2118 = dma.vmem_to_hbm [thread:$0]  (%p2652_p10), %s2940_s24, 2048, %s2938_s17, %s1623_s14, %s2443_s19, %s2443_s19, %s2446_s13  }
 0x441 PF: > { %s3030_s23 = sld [smem:[#allocation19_spill]]  ;;  %s3031_s25 = sld [smem:[#allocation21_spill]] }
 0x442   : > { %p3033_p7 = scmp.ge.s32.totalorder %s2431_s10, 2 }
 0x447   : > { %s1654_s27 = sand.u32 1, %s3030_s23   ;;  %p3032_p5 = scmp.ne.s32.totalorder %s3031_s25, 0 }
 0x448   : > { %s1655_s12 = scalar_lea.sflag [#allocation8], %s1654_s27 }
 0x449   : > { %p2135_p9 = pnand %p3033_p7, %p3032_p5 }
 0x44b   : > { %2406 = dma.done.wait (!%p2135_p9), %s1655_s12, 2048  }
 0x44c   : > { %2408 = vsyncadd (!%p2135_p9), %s1655_s12, 4294965248  ;;  %s26_s10 = sadd.s32 1, %s2431_s10   ;;  %s3034_s27 = smov %s2415_s28 }
 0x44d   : > { %p23_p0 = scmp.ge.s32.totalorder %s26_s10, 4   ;;  %s3035_s28 = smov %s2419_s29 }
 0x44e   : > { %s3036_s29 = smov %s2664_s11  ;;  %s3037_s30 = smov %s2427_s9 }
 0x44f   : > { %s3038_s9 = smov %s3040_s20  ;;  %25 = sbr.rel (!%p23_p0) target bundleno = 11 (0xb), region = 115 }
 0x456   :  { %1660 = vsyncpa [#allocation7], 1 }
 0x457   :  { %1662 = vsyncpa [#allocation7 + $0x1], 1 }
 0x458   :  { %1663 = vsyncpa [#allocation10], 1 }
 0x459   :  { %1664 = vsyncpa [#allocation13], 1 }
 0x45a   :  { %1665 = vsyncpa [#allocation8], 1 }
 0x45b   :  { %1667 = vsyncpa [#allocation8 + $0x1], 1 }

</bundles_post_ra>
